<compile_context>
chip_gen: v7x
topology: tpu7x:2x2x1
jax: 0.10.0
libtpu: 0.0.40
codegen_flags: <defaults>
</compile_context>

<pallas_src>
import functools

import jax
import jax.numpy as jnp
from jax.experimental import pallas as pl
from jax.experimental.pallas import tpu as pltpu

_LANE_CHOICES = (8192, 4096, 2048, 1024, 512, 256, 128)
_SMALL_INPUT_ELEMS = 1 << 18     # ~256K elems (1 MiB f32): below this jnp.clip wins


def _clamp_kernel(x_ref, o_ref, *, min_val, max_val):
    # min_val/max_val are compile-time Python scalars -> VPU splat immediates.
    o_ref[...] = jnp.clip(x_ref[...], min_val, max_val).astype(o_ref.dtype)


def _block_config():
    """Generation-aware (target_block_bytes, vmem_limit_bytes)."""
    try:
        vmem_bytes = int(pltpu.get_tpu_info().vmem_capacity_bytes)
    except Exception:
        vmem_bytes = 64 * 1024 * 1024          # conservative: v7x per-TensorCore VMEM
    if vmem_bytes >= 128 * 1024 * 1024:        # v5e / v6e
        return 8 * 1024 * 1024, 48 * 1024 * 1024
    # v7x (64 MiB per TC): 4 live buffers at 6 MiB = 24 MiB, plenty of headroom.
    return 6 * 1024 * 1024, 40 * 1024 * 1024


def clamp_pallas(x, min_val=0.0, max_val=1.0, *, force_pallas=False):
    """Elementwise clamp via a Pallas TPU kernel. Same shape/dtype as input."""
    orig_shape = x.shape
    dtype = x.dtype
    total = x.size

    # Bounds as Python scalars (weakly typed) -> no captured array constants,
    # no silent dtype surprises at the store.
    if jnp.issubdtype(dtype, jnp.floating):
        lo, hi = float(min_val), float(max_val)
    else:
        lo, hi = int(min_val), int(max_val)

    if total == 0:
        return x
    if total < _SMALL_INPUT_ELEMS and not force_pallas:
        # Launch/pipeline-setup overhead dominates for tiny tensors.
        return jnp.clip(x, lo, hi)

    # Widest lane count that divides the flattened size -> contiguous lane-dense
    # 2D slab with no pad copy and unmasked wide stores.
    lanes = next((c for c in _LANE_CHOICES if total % c == 0), None)
    if lanes is None:
        # Awkward size (not a multiple of 128 elements).  Any pad+slice or
        # prefix+tail+concat scheme adds full extra HBM copies to a purely
        # memory-bound op, so XLA's fused clip (already at roofline) is faster.
        return jnp.clip(x, lo, hi)

    itemsize = jnp.dtype(dtype).itemsize
    packing = 8 * max(1, 4 // itemsize)        # sublane rows: f32 8, bf16 16, int8 32
    rows = total // lanes
    x2d = x.reshape(rows, lanes)               # free, layout-preserving reshape

    target_block_bytes, vmem_limit = _block_config()
    row_bytes = lanes * itemsize
    block_rows = max(packing,
                     (target_block_bytes // row_bytes) // packing * packing)
    if block_rows * 2 > rows:
        if rows >= 2 * packing:
            # Split into (at least) two blocks so both v7x TensorCores each
            # stream roughly half of this memory-bound op.
            block_rows = pl.cdiv(rows, 2 * packing) * packing
        else:
            block_rows = rows                  # tiny: single full-height block
    grid = (pl.cdiv(rows, block_rows),)

    kernel = functools.partial(_clamp_kernel, min_val=lo, max_val=hi)

    out2d = pl.pallas_call(
        kernel,
        out_shape=jax.ShapeDtypeStruct((rows, lanes), dtype),
        grid_spec=pltpu.PrefetchScalarGridSpec(
            num_scalar_prefetch=0,
            grid=grid,
            in_specs=[pl.BlockSpec((block_rows, lanes), lambda i: (i, 0))],
            out_specs=pl.BlockSpec((block_rows, lanes), lambda i: (i, 0)),
        ),
        input_output_aliases={0: 0},
        compiler_params=pltpu.CompilerParams(
            dimension_semantics=("parallel",),
            vmem_limit_bytes=vmem_limit,
        ),
    )(x2d)

    return out2d.reshape(orig_shape)


if __name__ == "__main__":
    key = jax.random.PRNGKey(0)
    # Small NCHW tensor consistent with a segmentation-head activation.
    x = jax.random.normal(key, (2, 4, 16, 16), dtype=jnp.float32) * 2.0
    y_ref = jnp.clip(x, 0.0, 1.0)

    # Force the Pallas kernel path even for this small demo tensor.
    y = jax.block_until_ready(clamp_pallas(x, 0.0, 1.0, force_pallas=True))
    assert y.shape == x.shape and y.dtype == x.dtype
    assert jnp.allclose(y, y_ref), "mismatch vs reference clamp (kernel path)"

    # Default path for tiny tensors bypasses the kernel; still must match.
    y_small = jax.block_until_ready(clamp_pallas(x, 0.0, 1.0))
    assert jnp.allclose(y_small, y_ref), "mismatch vs reference clamp (bypass path)"

    # Larger activation map exercising the multi-block kernel path (>=2 grid steps).
    x_big = jax.random.normal(jax.random.PRNGKey(1), (2, 8, 128, 256),
                              dtype=jnp.float32) * 3.0
    y_big_ref = jnp.clip(x_big, 0.0, 1.0)
    y_big = jax.block_until_ready(clamp_pallas(x_big, 0.0, 1.0))
    assert jnp.allclose(y_big, y_big_ref), "mismatch on large input"

    print("KERNEL_OK")
</pallas_src>

<mosaic_0001>
module attributes {stable_mosaic.version = 11 : i64} {
  func.func @_clamp_kernel(%arg0: i32, %arg1: memref<1x2048xf32, #tpu.memory_space<vmem>>, %arg2: memref<1x2048xf32, #tpu.memory_space<vmem>>) attributes {dimension_semantics = [#tpu.dimension_semantics<parallel>], iteration_bounds = array<i64: 1>, scalar_prefetch = 0 : i64, scratch_operands = 0 : i64, tpu.core_type = #tpu.core_type<tc>, window_params = [{transform_indices = @transform_0, window_bounds = array<i64: 1, 2048>}, {transform_indices = @transform_1, window_bounds = array<i64: 1, 2048>}]} {
    %c0 = arith.constant 0 : index
    %c0_0 = arith.constant 0 : index
    %0 = vector.load %arg1[%c0, %c0_0] : memref<1x2048xf32, #tpu.memory_space<vmem>>, vector<1x2048xf32>
    %cst = arith.constant 0.000000e+00 : f32
    %cst_1 = arith.constant 1.000000e+00 : f32
    %1 = vector.broadcast %cst : f32 to vector<1x2048xf32>
    %2 = arith.maximumf %1, %0 : vector<1x2048xf32>
    %3 = vector.broadcast %cst_1 : f32 to vector<1x2048xf32>
    %4 = arith.minimumf %3, %2 : vector<1x2048xf32>
    %c0_2 = arith.constant 0 : index
    %c0_3 = arith.constant 0 : index
    %5 = vector.load %arg2[%c0_2, %c0_3] : memref<1x2048xf32, #tpu.memory_space<vmem>>, vector<1x2048xf32>
    tpu.vector_store %arg2[%c0_2, %c0_3], %4 {strides = array<i32>} : memref<1x2048xf32, #tpu.memory_space<vmem>>, vector<1x2048xf32>,
    return
  }
  func.func @transform_0(%arg0: i32) -> (i32, i32) {
    %c0_i32 = arith.constant 0 : i32
    %c0_i32_0 = arith.constant 0 : i32
    return %arg0, %c0_i32 : i32, i32
  }
  func.func @transform_1(%arg0: i32) -> (i32, i32) {
    %c0_i32 = arith.constant 0 : i32
    %c0_i32_0 = arith.constant 0 : i32
    return %arg0, %c0_i32 : i32, i32
  }
}

</mosaic_0001>

<bundles_post_ra>
// kernel: tpu_custom_call.1
= control target key start
LH: loop header
LB: loop body
LE: loop exit
PB: predicated region body
PF: predicated region fallthrough
CT: control target
= control target key end

     0   :  { %6 = vsyncpa [#allocation3], 0  ;;  %s130_s0 = inlined_call_operand.hbm [shape: f32[1,2048], index: 0, kind: input, shape index: {}, may-alias: {0,1}]   ;;  %s131_s1 = inlined_call_operand.hbm [shape: f32[1,2048], index: 1, kind: output, shape index: {}, may-alias: {0,1}]  }
   0x1   :  { %7 = vsyncpa [#allocation4], 0  ;;  %s94_s6 = smov [#allocation2]   ;;  %s46_s10 = scalar_lea.hbm %s130_s0, 256 }
   0x2   :  { %s14_s7 = sshll.u32 %s94_s6, 4  ;;  %p47_p0 = scmp.ne.s32.totalorder %s130_s0, %s46_s10  ;;  %s15_s7 = int_to_ptr.vmem [resolvable:$true] %s14_s7 }
   0x3   :  { %p50_p1 = scmp.lt.u32.totalorder %s46_s10, %s130_s0 }
   0x5   :  { %p52_p2 = pnand %p50_p1, %p47_p0 }
   0x7   :  { %55 = shalt.err (!%p52_p2)
}
   0x8   :  { %s56_s15 = scalar_lea.vmem %s15_s7, 256  ;;  %p61_p4 = scmp.lt.s32.totalorder %s15_s7, %s15_s7 }
   0x9   :  { %p57_p3 = scmp.ne.s32.totalorder %s15_s7, %s56_s15  ;;  %p62_p5 = scmp.lt.s32.totalorder %s56_s15, %s56_s15 }
   0xb   :  { %p63_p6 = por %p62_p5, %p61_p4 }
   0xd   :  { %p64_p7 = pnand %p63_p6, %p57_p3 }
   0xf   :  { %67 = shalt.err (!%p64_p7)
}
  0x10   :  { %17 = dma.hbm_to_vmem [thread:$0]  %s130_s0, 256, %s15_s7, [#allocation3]  }
  0x11   :  { %90 = dma.done.wait [#allocation3], 256  }
  0x12   :  { %91 = vsyncadd [#allocation3], 4294967040  ;;  %v21_v0 = vld [vmem:[#allocation2] sm:$0xff]  ;;  %v22_v1 = vld [vmem:[#allocation2 + $0x8] sm:$0xff]  ;;  %s95_s18 = smov [#allocation5]  }
  0x13   :  { %s35_s19 = sshll.u32 %s95_s18, 4  ;;  %v23_v2 = vmax.f32 %v21_v0, 0.0  ;;  %v24_v3 = vmax.f32 %v22_v1, 0.0  ;;  %s36_s19 = int_to_ptr.vmem [resolvable:$true] %s35_s19 }
  0x14   :  { %s68_s20 = scalar_lea.vmem %s36_s19, 256  ;;  %p73_p9 = scmp.lt.s32.totalorder %s36_s19, %s36_s19 }
  0x15   :  { %v25_v4 = vmin.f32 %v23_v2, 1.0  ;;  %v26_v5 = vmin.f32 %v24_v3, 1.0  ;;  %p69_p8 = scmp.ne.s32.totalorder %s36_s19, %s68_s20  ;;  %p74_p10 = scmp.lt.s32.totalorder %s68_s20, %s68_s20 }
  0x17   :  { %27 = vst [vmem:[#allocation5] sm:$0xff] %v25_v4  ;;  %28 = vst [vmem:[#allocation5 + $0x8] sm:$0xff] %v26_v5  ;;  %p75_p11 = por %p74_p10, %p73_p9 }
  0x19   :  { %p76_p12 = pnand %p75_p11, %p69_p8 }
  0x1b   :  { %79 = shalt.err (!%p76_p12)
}
  0x1c   :  { %s80_s22 = scalar_lea.hbm %s131_s1, 256 }
  0x1d   :  { %p81_p13 = scmp.ne.s32.totalorder %s131_s1, %s80_s22  ;;  %p84_p0 = scmp.lt.u32.totalorder %s80_s22, %s131_s1 }
  0x1f   :  { %p86_p1 = pnand %p84_p0, %p81_p13 }
  0x21   :  { %89 = shalt.err (!%p86_p1)
}
  0x22   :  { %38 = dma.vmem_to_hbm [thread:$0]  %s36_s19, 256, %s131_s1, [#allocation4]  }
  0x23   :  { %92 = dma.done.wait [#allocation4], 256  }
  0x24   :  { %93 = vsyncadd [#allocation4], 4294967040 }
  0x25   :  { %42 = vsyncpa [#allocation3], 1 }
  0x26   :  { %43 = vsyncpa [#allocation4], 1 }

</bundles_post_ra>
